<compile_context>
chip_gen: v7x
topology: tpu7x:2x2x1
jax: 0.10.0
libtpu: 0.0.40
codegen_flags: <defaults>
</compile_context>

<pallas_src>
import jax
import jax.numpy as jnp
from jax.experimental import pallas as pl
from jax.experimental.pallas import tpu as pltpu


def categorical_policy_kernel(x_ref, w_ref, b_ref, cand_ref, out_ref):
    """x: (B, S); w: (S, D); b: (1, D); cand: (B, A_pad, D); out: (B, 1, A_pad)."""
    # Folded state_fc: (B, S) @ (S, D) + (1, D) -> (B, D), f32 accumulation.
    s_latent = (
        jnp.dot(x_ref[...], w_ref[...], preferred_element_type=jnp.float32)
        + b_ref[...]
    )
    # Batched contraction with the candidate features on the MXU:
    #   (B, 1, D) x (B, A_pad, D) -> (B, 1, A_pad)
    # (the .astype is a no-op for f32 inputs; it keeps bf16 candidates on the
    #  native MXU path instead of upcasting them on the VPU).
    scores = jnp.einsum(
        "bqd,bkd->bqk",
        s_latent[:, None, :].astype(cand_ref.dtype),
        cand_ref[...],
        preferred_element_type=jnp.float32,
    )
    # Lane-dense (A_pad is a multiple of 128) unmasked store.
    out_ref[...] = scores.astype(out_ref.dtype)


def categorical_policy_forward(belief_states, candidate_action_features,
                               w1, b1, w2, b2):
    """belief_states: (B, S); candidate_action_features: (B, A, D).

    Weights are stored transposed vs. PyTorch nn.Linear, i.e. (in, out), and
    biases as (1, out), so the math is x @ W + b.
    """
    B, _ = belief_states.shape
    _, A, _ = candidate_action_features.shape

    # Fold the two affine layers (no intervening nonlinearity):
    #   (x @ w1 + b1) @ w2 + b2 == x @ (w1 @ w2) + (b1 @ w2 + b2)
    w_fused = jnp.dot(w1, w2, preferred_element_type=jnp.float32)        # (S, D)
    b_fused = jnp.dot(b1, w2, preferred_element_type=jnp.float32) + b2   # (1, D)

    # Lane-dense output: pad the action axis up to a multiple of 128 lanes so
    # the kernel's output store is a full vreg-width vst (not a masked store).
    a_pad = ((A + 127) // 128) * 128
    cand = candidate_action_features
    if a_pad != A:
        cand = jnp.pad(cand, ((0, 0), (0, a_pad - A), (0, 0)))

    vmem = pl.BlockSpec(memory_space=pltpu.MemorySpace.VMEM)
    out_padded = pl.pallas_call(
        categorical_policy_kernel,
        out_shape=jax.ShapeDtypeStruct((B, 1, a_pad), jnp.float32),
        in_specs=[vmem] * 4,
        out_specs=vmem,
    )(belief_states, w_fused, b_fused, cand)
    return out_padded[:, 0, :A]


def _reference(belief_states, candidate_action_features, w1, b1, w2, b2):
    # Unfolded two-layer form, matching the PyTorch module exactly.
    h = belief_states @ w1 + b1
    s = h @ w2 + b2                                   # (B, D)
    return jnp.einsum("bad,bd->ba", candidate_action_features, s)


if __name__ == "__main__":
    # Small, deterministic shapes consistent with the module's forward.
    batch_size = 2
    state_dim = 32
    action_dim = 16
    action_space = 8

    key = jax.random.PRNGKey(0)
    k_x, k_c, k_w1, k_b1, k_w2, k_b2 = jax.random.split(key, 6)

    belief_states = jax.random.normal(k_x, (batch_size, state_dim), jnp.float32)
    candidate_action_features = jax.random.normal(
        k_c, (batch_size, action_space, action_dim), jnp.float32)

    # Deterministic parameter init (nn.Linear-style uniform bounds).
    bound1 = 1.0 / (state_dim ** 0.5)
    bound2 = 1.0 / (action_dim ** 0.5)
    # Stored transposed vs PyTorch: (in_features, out_features).
    w1 = jax.random.uniform(k_w1, (state_dim, action_dim), jnp.float32,
                            -bound1, bound1)
    b1 = jax.random.uniform(k_b1, (1, action_dim), jnp.float32, -bound1, bound1)
    w2 = jax.random.uniform(k_w2, (action_dim, action_dim), jnp.float32,
                            -bound2, bound2)
    b2 = jax.random.uniform(k_b2, (1, action_dim), jnp.float32, -bound2, bound2)

    out = categorical_policy_forward(belief_states, candidate_action_features,
                                     w1, b1, w2, b2)
    out = jax.block_until_ready(out)

    ref = _reference(belief_states, candidate_action_features, w1, b1, w2, b2)
    assert out.shape == (batch_size, action_space)
    assert jnp.allclose(out, ref, atol=1e-4, rtol=1e-4), (out, ref)

    print("KERNEL_OK")
</pallas_src>

<mosaic_0001>
module attributes {stable_mosaic.version = 11 : i64} {
  func.func @categorical_policy_kernel(%arg0: memref<2x32xf32, #tpu.memory_space<vmem>>, %arg1: memref<32x16xf32, #tpu.memory_space<vmem>>, %arg2: memref<1x16xf32, #tpu.memory_space<vmem>>, %arg3: memref<2x128x16xf32, #tpu.memory_space<vmem>>, %arg4: memref<2x1x128xf32, #tpu.memory_space<vmem>>) attributes {dimension_semantics = [], scalar_prefetch = 0 : i64, scratch_operands = 0 : i64, tpu.core_type = #tpu.core_type<tc>} {
    %c0 = arith.constant 0 : index
    %c0_0 = arith.constant 0 : index
    %0 = vector.load %arg0[%c0, %c0_0] : memref<2x32xf32, #tpu.memory_space<vmem>>, vector<2x32xf32>
    %c0_1 = arith.constant 0 : index
    %c0_2 = arith.constant 0 : index
    %1 = vector.load %arg1[%c0_1, %c0_2] : memref<32x16xf32, #tpu.memory_space<vmem>>, vector<32x16xf32>
    %cst = arith.constant dense<0.000000e+00> : vector<2x16xf32>
    %2 = tpu.matmul %0, %1, %cst {dimension_numbers = #tpu.dot_dimension_numbers<[1], [0], [0], [1], [0, 0, 1, 1], [], []>} : vector<2x32xf32>, vector<32x16xf32>, vector<2x16xf32> -> vector<2x16xf32>
    %c0_3 = arith.constant 0 : index
    %c0_4 = arith.constant 0 : index
    %3 = vector.load %arg2[%c0_3, %c0_4] : memref<1x16xf32, #tpu.memory_space<vmem>>, vector<1x16xf32>
    %4 = vector.broadcast %3 : vector<1x16xf32> to vector<2x16xf32>
    %5 = arith.addf %2, %4 : vector<2x16xf32>
    %6 = vector.shape_cast %5 : vector<2x16xf32> to vector<2x1x16xf32>
    %c0_5 = arith.constant 0 : index
    %c0_6 = arith.constant 0 : index
    %c0_7 = arith.constant 0 : index
    %7 = vector.load %arg3[%c0_5, %c0_6, %c0_7] : memref<2x128x16xf32, #tpu.memory_space<vmem>>, vector<2x128x16xf32>
    "tpu.trace_start"() <{level = 10 : i32, message = "bqd,bkd->bqk"}> : () -> ()
    %cst_8 = arith.constant dense<0.000000e+00> : vector<2x1x128xf32>
    %8 = tpu.matmul %6, %7, %cst_8 {dimension_numbers = #tpu.dot_dimension_numbers<[2], [2], [1], [1], [0, 0, 0, 1, 1, 1], [0], [0]>} : vector<2x1x16xf32>, vector<2x128x16xf32>, vector<2x1x128xf32> -> vector<2x1x128xf32>
    "tpu.trace_stop"() : () -> ()
    %c0_9 = arith.constant 0 : index
    %c0_10 = arith.constant 0 : index
    %c0_11 = arith.constant 0 : index
    %9 = vector.load %arg4[%c0_9, %c0_10, %c0_11] : memref<2x1x128xf32, #tpu.memory_space<vmem>>, vector<2x1x128xf32>
    tpu.vector_store %arg4[%c0_9, %c0_10, %c0_11], %8 {strides = array<i32>} : memref<2x1x128xf32, #tpu.memory_space<vmem>>, vector<2x1x128xf32>,
    return
  }
}

</mosaic_0001>

<bundles_post_ra>
// kernel: tpu_custom_call.1
= control target key start
LH: loop header
LB: loop body
LE: loop exit
PB: predicated region body
PF: predicated region fallthrough
CT: control target
= control target key end

     0   :  { %v675_v3 = vmov 0.0|0.0   ;;  %vm676_vm0 = vmmov 0   ;;  %v677_v6 = vmov 0.0   ;;  %vm159_vm1 = vcmask 130048   ;;  %s894_s0 = inlined_call_operand.vmem [shape: f32[2,32], index: 0, kind: input, shape index: {}]   ;;  %s895_s1 = inlined_call_operand.vmem [shape: f32[32,16], index: 1, kind: input, shape index: {}]   ;;  %s896_s2 = inlined_call_operand.vmem [shape: f32[1,16], index: 2, kind: input, shape index: {}]   ;;  %s897_s3 = inlined_call_operand.vmem [shape: f32[2,128,16], index: 3, kind: input, shape index: {}]   ;;  %s898_s4 = inlined_call_operand.hbm [shape: f32[2,1,128], index: 4, kind: output, shape index: {}]  }
   0x1   :  { %v19_v0 = vld [vmem:[%s895_s1] sm:$0xff]  ;;  %v20_v1 = vld [vmem:[%s895_s1 + $0x8] sm:$0xff]  ;;  %v21_v2 = vld [vmem:[%s895_s1 + $0x10] sm:$0xff]  ;;  %574 = vmatprep.subr.bf16.mxu0 %v675_v3  ;;  %501 = vmatprep.mubr.msk.f32.mxu0 %vm676_vm0, %v677_v6  ;;  %vm30_vm3 = vcmask 261120  }
   0x2   :  { %v575_v4 = vpack.c.bf16 %v20_v1, %v19_v0  ;;  %v22_v5 = vld [vmem:[%s895_s1 + $0x18] sm:$0xff]  ;;  %v127_v7 = vld [vmem:[%s897_s3] sm:$0xff]  ;;  %580 = vmatprep.subr.bf16.mxu1 %v675_v3  ;;  %v128_v8 = vld [vmem:[%s897_s3 + $0x8] sm:$0xff]  ;;  %536 = vmatprep.mubr.msk.f32.mxu1 %vm676_vm0, %v677_v6 }
   0x3   :  { %vm730_vm2 = vmpackc.low %vm159_vm1, %vm159_vm1  ;;  %v578_v10 = vpack.c.bf16 %v22_v5, %v21_v2  ;;  %v581_v11 = vpack.c.bf16 %v128_v8, %v127_v7  ;;  %v129_v12 = vld [vmem:[%s897_s3 + $0x10] sm:$0xff]  ;;  %v130_v13 = vld [vmem:[%s897_s3 + $0x18] sm:$0xff] }
   0x4   :  { %576 = vmatpush3.bf16.msra.mxu0 %v575_v4  ;;  %v18_v14 = vld [vmem:[%s894_s0] sm:$0x3]  ;;  %v144_v16 = vld [vmem:[%s897_s3 + $0x88] sm:$0xff]  ;;  %v585_v17 = vpack.c.bf16 %v130_v13, %v129_v12 }
   0x5   :  { %577 = vmatprep.subr.bf16.mxu0 %v675_v3  ;;  %583 = vmatpush3.bf16.xpose.msk.msra.mxu1 %vm730_vm2, %v581_v11  ;;  %v143_v15 = vld [vmem:[%s897_s3 + $0x80] sm:$0xff] }
   0x6   :  { %584 = vmatprep.subr.bf16.mxu1 %v675_v3 }
   0x8   :  { %579 = vmatpush3.bf16.msra.mxu0 %v578_v10 }
   0x9   :  { %612 = vmatprep.subr.bf16.mxu0 %v675_v3 }
   0xb   :  { %502 = vmatmul.mubr.msk.f32.vlgmr.msra.gmra.mrb[0].mxu0 %vm30_vm3, %v18_v14 }
   0xc   :  { %571 = vmatprep.mubr.msk.f32.mxu0 %vm676_vm0, %v677_v6 }
   0xd   :  { %9 = vsyncpa [#allocation3], 0  ;;  %v613_v18 = vpack.c.bf16 %v144_v16, %v143_v15  ;;  %587 = vmatpush3.bf16.xpose.msk.msra.mxu1 %vm730_vm2, %v585_v17  ;;  %v131_v19 = vld [vmem:[%s897_s3 + $0x20] sm:$0xff]  ;;  %v132_v20 = vld [vmem:[%s897_s3 + $0x28] sm:$0xff]  ;;  %v678_v58 = vmov 1966171168   ;;  %v108_v60 = vlaneseq }
   0xe   :  { %588 = vmatprep.subr.bf16.mxu1 %v675_v3  ;;  %v145_v21 = vld [vmem:[%s897_s3 + $0x90] sm:$0xff]  ;;  %v146_v22 = vld [vmem:[%s897_s3 + $0x98] sm:$0xff]  ;;  %v589_v23 = vpack.c.bf16 %v132_v20, %v131_v19  ;;  %v147_v27 = vld [vmem:[%s897_s3 + $0xa0] sm:$0xff]  ;;  %v106_v59 = vunpack.c.l.s4 %v678_v58 }
   0xf   :  { %v617_v24 = vpack.c.bf16 %v146_v22, %v145_v21  ;;  %v133_v25 = vld [vmem:[%s897_s3 + $0x30] sm:$0xff]  ;;  %v134_v26 = vld [vmem:[%s897_s3 + $0x38] sm:$0xff]  ;;  %v148_v28 = vld [vmem:[%s897_s3 + $0xa8] sm:$0xff]  ;;  %v109_v62 = vshrl.u32 %v108_v60, 7 }
  0x10   :  { %v593_v29 = vpack.c.bf16 %v134_v26, %v133_v25  ;;  %v621_v30 = vpack.c.bf16 %v148_v28, %v147_v27  ;;  %v135_v31 = vld [vmem:[%s897_s3 + $0x40] sm:$0xff]  ;;  %v136_v32 = vld [vmem:[%s897_s3 + $0x48] sm:$0xff]  ;;  %v149_v33 = vld [vmem:[%s897_s3 + $0xb0] sm:$0xff]  ;;  %v107_v61 = vunpack.c.0.s8 %v106_v59 }
  0x11   :  { %615 = vmatpush3.bf16.xpose.msk.msra.mxu0 %vm730_vm2, %v613_v18  ;;  %v150_v34 = vld [vmem:[%s897_s3 + $0xb8] sm:$0xff]  ;;  %v597_v35 = vpack.c.bf16 %v136_v32, %v135_v31  ;;  %v137_v37 = vld [vmem:[%s897_s3 + $0x50] sm:$0xff]  ;;  %v151_v39 = vld [vmem:[%s897_s3 + $0xc0] sm:$0xff] }
  0x12   :  { %616 = vmatprep.subr.bf16.mxu0 %v675_v3  ;;  %v625_v36 = vpack.c.bf16 %v150_v34, %v149_v33  ;;  %v138_v38 = vld [vmem:[%s897_s3 + $0x58] sm:$0xff]  ;;  %v152_v40 = vld [vmem:[%s897_s3 + $0xc8] sm:$0xff]  ;;  %v139_v43 = vld [vmem:[%s897_s3 + $0x60] sm:$0xff]  ;;  %v110_v0 = vsub.s32 %v107_v61, %v109_v62 }
  0x13   :  { %v601_v41 = vpack.c.bf16 %v138_v38, %v137_v37  ;;  %v629_v42 = vpack.c.bf16 %v152_v40, %v151_v39  ;;  %v140_v44 = vld [vmem:[%s897_s3 + $0x68] sm:$0xff]  ;;  %v153_v45 = vld [vmem:[%s897_s3 + $0xd0] sm:$0xff]  ;;  %v154_v46 = vld [vmem:[%s897_s3 + $0xd8] sm:$0xff] }
  0x14   :  { %v605_v47 = vpack.c.bf16 %v140_v44, %v139_v43  ;;  %v633_v48 = vpack.c.bf16 %v154_v46, %v153_v45  ;;  %v155_v49 = vld [vmem:[%s897_s3 + $0xe0] sm:$0xff]  ;;  %v156_v50 = vld [vmem:[%s897_s3 + $0xe8] sm:$0xff]  ;;  %v141_v52 = vld [vmem:[%s897_s3 + $0x70] sm:$0xff] }
  0x15   :  { %591 = vmatpush3.bf16.xpose.msk.msra.mxu1 %vm730_vm2, %v589_v23  ;;  %v637_v51 = vpack.c.bf16 %v156_v50, %v155_v49  ;;  %v142_v53 = vld [vmem:[%s897_s3 + $0x78] sm:$0xff]  ;;  %v157_v55 = vld [vmem:[%s897_s3 + $0xf0] sm:$0xff]  ;;  %v418_v63 = vld [vmem:[%s896_s2] ss:$0 sm:$0xff] }
  0x16   :  { %592 = vmatprep.subr.bf16.mxu1 %v675_v3  ;;  %v609_v54 = vpack.c.bf16 %v142_v53, %v141_v52  ;;  %v158_v56 = vld [vmem:[%s897_s3 + $0xf8] sm:$0xff]  ;;  %s679_s3 = smov [#allocation2]  }
  0x17   :  { %v641_v57 = vpack.c.bf16 %v158_v56, %v157_v55  ;;  %s407_s8 = sshll.u32 %s679_s3, 4  ;;  %s408_s8 = int_to_ptr.vmem [resolvable:$true] %s407_s8 }
  0x18   :  { %s651_s2 = scalar_lea.vmem %s408_s8, 32  ;;  %p656_p1 = scmp.lt.s32.totalorder %s408_s8, %s408_s8 }
  0x19   :  { %619 = vmatpush3.bf16.xpose.msk.msra.mxu0 %vm730_vm2, %v617_v24  ;;  %p652_p0 = scmp.ne.s32.totalorder %s408_s8, %s651_s2  ;;  %p657_p2 = scmp.lt.s32.totalorder %s651_s2, %s651_s2 }
  0x1a   :  { %620 = vmatprep.subr.bf16.mxu0 %v675_v3 }
  0x1b   :  { %p658_p3 = por %p657_p2, %p656_p1 }
  0x1d   :  { %595 = vmatpush3.bf16.xpose.msk.msra.mxu1 %vm730_vm2, %v593_v29  ;;  %p659_p4 = pnand %p658_p3, %p652_p0 }
  0x1e   :  { %596 = vmatprep.subr.bf16.mxu1 %v675_v3 }
  0x21   :  { %623 = vmatpush3.bf16.xpose.msk.msra.mxu0 %vm730_vm2, %v621_v30 }
  0x22   :  { %624 = vmatprep.subr.bf16.mxu0 %v675_v3 }
  0x25   :  { %599 = vmatpush3.bf16.xpose.msk.msra.mxu1 %vm730_vm2, %v597_v35 }
  0x26   :  { %600 = vmatprep.subr.bf16.mxu1 %v675_v3 }
  0x29   :  { %627 = vmatpush3.bf16.xpose.msk.msra.mxu0 %vm730_vm2, %v625_v36 }
  0x2a   :  { %628 = vmatprep.subr.bf16.mxu0 %v675_v3 }
  0x2d   :  { %603 = vmatpush3.bf16.xpose.msk.msra.mxu1 %vm730_vm2, %v601_v41 }
  0x2e   :  { %604 = vmatprep.subr.bf16.mxu1 %v675_v3 }
  0x31   :  { %631 = vmatpush3.bf16.xpose.msk.msra.mxu0 %vm730_vm2, %v629_v42 }
  0x32   :  { %632 = vmatprep.subr.bf16.mxu0 %v675_v3 }
  0x35   :  { %607 = vmatpush3.bf16.xpose.msk.msra.mxu1 %vm730_vm2, %v605_v47 }
  0x36   :  { %608 = vmatprep.subr.bf16.mxu1 %v675_v3 }
  0x39   :  { %635 = vmatpush3.bf16.xpose.msk.msra.mxu0 %vm730_vm2, %v633_v48 }
  0x3a   :  { %636 = vmatprep.subr.bf16.mxu0 %v675_v3 }
  0x3d   :  { %611 = vmatpush3.bf16.xpose.msk.msra.mxu1 %vm730_vm2, %v609_v54 }
  0x41   :  { %639 = vmatpush3.bf16.xpose.msk.msra.mxu0 %vm730_vm2, %v637_v51 }
  0x42   :  { %640 = vmatprep.subr.bf16.mxu0 %v675_v3 }
  0x49   :  { %643 = vmatpush3.bf16.xpose.msk.msra.mxu0 %vm730_vm2, %v641_v57 }
  0xde   :  { %v100_v1 = vpop.f32.mrb[0].mxu0 }
  0xdf   :  { %v101_v2 = vadd.f32 %v418_v63, %v100_v1  ;;  %v503_v3 = vpop.f32.mrb[1].mxu0 }
  0xe1   :  { %v111_v4 = vrot.slane %v101_v2, %v110_v0 }
  0xe3   :  { %v112_v5 = vcombine.high %v111_v4, %v111_v4  ;;  %v119_v6 = vrot.slane %v111_v4, %v110_v0 }
  0xe5   :  { %v126_v7 = vrot.slane %v112_v5, %v110_v0  ;;  %537 = vmatmul.mubr.msk.f32.vlgmr.msra.gmra.mrb[0].mxu1 %vm159_vm1, %v119_v6 }
  0xe7   :  { %572 = vmatmul.mubr.msk.f32.vlgmr.msra.gmra.mrb[2].mxu0 %vm159_vm1, %v126_v7 }
 0x1b8   :  { %v276_v8 = vpop.f32.mrb[0].mxu1 }
 0x1b9   :  { %400 = vst [vmem:[#allocation2] sm:$0x1] %v276_v8  ;;  %v538_v9 = vpop.f32.mrb[1].mxu1 }
 0x1ba   :  { %v396_v10 = vpop.f32.mrb[2].mxu0 }
 0x1bb   :  { %401 = vst [vmem:[#allocation2 + $0x1] sm:$0x1] %v396_v10  ;;  %v573_v11 = vpop.f32.mrb[3].mxu0 }
 0x1bc   :  { %662 = shalt.err (!%p659_p4)
}
 0x1bd   :  { %s663_s10 = scalar_lea.hbm %s898_s4, 32 }
 0x1be   :  { %p664_p5 = scmp.ne.s32.totalorder %s898_s4, %s663_s10  ;;  %p667_p6 = scmp.lt.u32.totalorder %s663_s10, %s898_s4 }
 0x1c0   :  { %p669_p7 = pnand %p667_p6, %p664_p5 }
 0x1c2   :  { %672 = shalt.err (!%p669_p7)
}
 0x1c3   :  { %s680_s15 = smov 16   ;;  %s681_s16 = smov 1  }
 0x1c4   :  { %413 = dma.vmem_to_hbm [thread:$0]  %s408_s8, 32, %s898_s4, [#allocation3], %s680_s15, %s680_s15, %s681_s16  }
 0x1c5   :  { %673 = dma.done.wait [#allocation3], 32  }
 0x1c6   :  { %674 = vsyncadd [#allocation3], 4294967264 }
 0x1c7   :  { %417 = vsyncpa [#allocation3], 1 }

</bundles_post_ra>
